<compile_context>
chip_gen: v6e
topology: v6e:2x2x1
jax: 0.10.0
libtpu: 0.0.40
codegen_flags: <defaults>
</compile_context>

<pallas_src>
import jax
import jax.numpy as jnp
import numpy as np
from jax.experimental import pallas as pl
from jax.experimental.pallas import tpu as pltpu

_VMEM_LIMIT = 32 * 1024 * 1024     # raised scoped-VMEM cap (v5e default is 16 MiB)
_TILE_BUDGET = 12 << 20            # live-tile budget used when auto-picking tiles


def _round_up(x, m):
    return ((x + m - 1) // m) * m


def _const_spec(shape, index_map):
    """Grid-invariant operand: single-buffered (2nd pipeline buffer is waste)."""
    return pl.BlockSpec(shape, index_map, pipeline_mode=pl.Buffered(1))


# --------------------- input_proj: 1x1 conv as tiled matmul -------------------

def _proj_kernel(x_ref, w_ref, b_ref, o_ref):
    # One (image, spatial-tile): (D, C) @ (C, thw) on the MXU + bias on the VPU.
    # Activation streamed as f32 and cast to bf16 in-kernel (halves HBM bytes
    # vs a wrapper-side cast pass); accumulation stays f32.
    x = x_ref[0].astype(jnp.bfloat16)                       # (C, thw)
    acc = jnp.dot(w_ref[...], x, preferred_element_type=jnp.float32)
    o_ref[0] = (acc + b_ref[...]).astype(o_ref.dtype)


def _pick_hw_tile(C, D, HW, budget_bytes=_TILE_BUDGET):
    # Double-buffered f32 activation tile + f32 output tile per spatial column,
    # plus the single-buffered bf16 weight / bias.
    fixed = D * C * 2 + D * 4
    per_col = (C * 4 + D * 4) * 2
    avail = max(budget_bytes - fixed, per_col * 128)
    thw = max(128, (avail // per_col) // 128 * 128)
    return min(thw, _round_up(HW, 128))


def unitab_input_proj(src_nchw, proj_w, proj_b, *, thw=None,
                      out_dtype=jnp.float32):
    """nn.Conv2d(C_in, hidden, 1) == per-pixel matmul, kept channels-first.

    src stays f32 in HBM (cast to bf16 inside the kernel); reshape NCHW ->
    (N, C, H*W) is free; no NCHW<->NHWC transposes are materialized.
    """
    N, C, H, W = src_nchw.shape
    D = proj_w.shape[0]                                     # proj_w: (D, C, 1, 1)
    HW = H * W
    if thw is None:
        thw = _pick_hw_tile(C, D, HW)
    HW_pad = _round_up(HW, thw)

    x = src_nchw.reshape(N, C, HW)
    if HW_pad != HW:
        x = jnp.pad(x, ((0, 0), (0, 0), (0, HW_pad - HW)))
    w2d = proj_w.reshape(D, C)
    if w2d.dtype != jnp.bfloat16:
        w2d = w2d.astype(jnp.bfloat16)                      # tiny; cached in practice
    b2d = proj_b.reshape(D, 1).astype(jnp.float32)

    y = pl.pallas_call(
        _proj_kernel,
        out_shape=jax.ShapeDtypeStruct((N, D, HW_pad), out_dtype),
        grid_spec=pltpu.PrefetchScalarGridSpec(
            num_scalar_prefetch=0,
            grid=(N, HW_pad // thw),                        # image x spatial tiles
            in_specs=[
                pl.BlockSpec((1, C, thw), lambda n, h: (n, 0, h)),
                _const_spec((D, C), lambda n, h: (0, 0)),
                _const_spec((D, 1), lambda n, h: (0, 0)),
            ],
            out_specs=pl.BlockSpec((1, D, thw), lambda n, h: (n, 0, h)),
        ),
        compiler_params=pltpu.CompilerParams(
            dimension_semantics=("parallel", "parallel"),
            vmem_limit_bytes=_VMEM_LIMIT),
    )(x, w2d, b2d)

    if HW_pad != HW:
        y = y[:, :, :HW]
    return y.reshape(N, D, H, W)


# ------------- coordclass_embed (Classifier) fused with vocab argmax ----------

def _classifier_fused_kernel(h_ref, w_ref, b_ref, logits_ref, argmax_ref):
    # Whole vocab in one tile: logits = h @ W^T + b, argmax on the tile
    # (first-occurrence tie-break, matching torch / jnp argmax).
    h = h_ref[...].astype(jnp.bfloat16)                     # in-kernel cast
    logits = jax.lax.dot_general(
        h, w_ref[...], (((1,), (1,)), ((), ())),            # contract over D
        preferred_element_type=jnp.float32) + b_ref[...]
    logits_ref[...] = logits.astype(logits_ref.dtype)

    tm, V = logits.shape
    lane = jax.lax.broadcasted_iota(jnp.int32, (tm, V), 1)
    row_max = jnp.max(logits, axis=-1, keepdims=True)
    argmax_ref[...] = jnp.min(
        jnp.where(logits == row_max, lane, V), axis=-1, keepdims=True)


def _classifier_tiled_kernel(h_ref, w_ref, b_ref, logits_ref, argmax_ref,
                             m_sc, i_sc):
    # Vocab-tiled path: online running (max, argmax) across the "arbitrary"
    # vocab axis; argmax written once in the finalize step.
    j = pl.program_id(1)

    @pl.when(j == 0)
    def _():
        m_sc[...] = jnp.full_like(m_sc, -jnp.inf)
        i_sc[...] = jnp.zeros_like(i_sc)

    h = h_ref[...].astype(jnp.bfloat16)                     # in-kernel cast
    logits = jax.lax.dot_general(
        h, w_ref[...], (((1,), (1,)), ((), ())),            # contract over D
        preferred_element_type=jnp.float32) + b_ref[...]
    logits_ref[...] = logits.astype(logits_ref.dtype)

    tm, tv = logits.shape
    lane = jax.lax.broadcasted_iota(jnp.int32, (tm, tv), 1)
    tile_max = jnp.max(logits, axis=-1, keepdims=True)
    tile_arg = jnp.min(jnp.where(logits == tile_max, lane, tv),
                       axis=-1, keepdims=True) + j * tv
    better = tile_max > m_sc[...]                           # strict > keeps first hit
    i_sc[...] = jnp.where(better, tile_arg, i_sc[...])
    m_sc[...] = jnp.where(better, tile_max, m_sc[...])

    @pl.when(j == pl.num_programs(1) - 1)
    def _():
        argmax_ref[...] = i_sc[...]


def _pick_vocab_tile(tm, D, V, budget_bytes=_TILE_BUDGET):
    fixed = tm * D * 4 * 2 + tm * 8
    per_v = (tm * 4 + D * 2 + 4) * 2                        # logits + bf16 W + bias
    avail = max(budget_bytes - fixed, per_v * 128)
    tv = max(128, (avail // per_v) // 128 * 128)
    return min(tv, _round_up(V, 128))


def classifier_with_argmax(h, w_vd, b, *, tm=None, tv=None,
                           out_dtype=jnp.float32):
    """logits = h @ w^T + b and argmax(logits, -1).

    h: (M, D) f32 (cast to bf16 in-kernel), w_vd: (V, D) tied embedding
    (used as-is, no transpose materialized), b: (V,).
    """
    M, D = h.shape
    V, D2 = w_vd.shape
    assert D == D2

    if tm is None:
        # MXU-pass granularity; zeros padding is free compute.
        tm = min(256, _round_up(M, 128))
    M_pad = _round_up(M, tm)
    if tv is None:
        tv = _pick_vocab_tile(tm, D, V)

    h_p = h if M_pad == M else jnp.pad(h, ((0, M_pad - M), (0, 0)))
    w_b = w_vd if w_vd.dtype == jnp.bfloat16 else w_vd.astype(jnp.bfloat16)

    cparams = dict(vmem_limit_bytes=_VMEM_LIMIT)

    if tv >= V:
        # ------- fused single-vocab-step path (small tied vocab) -------------
        b2d = b.reshape(1, V).astype(jnp.float32)
        logits, argm = pl.pallas_call(
            _classifier_fused_kernel,
            out_shape=(jax.ShapeDtypeStruct((M_pad, V), out_dtype),
                       jax.ShapeDtypeStruct((M_pad, 1), jnp.int32)),
            grid_spec=pltpu.PrefetchScalarGridSpec(
                num_scalar_prefetch=0,
                grid=(M_pad // tm,),
                in_specs=[
                    pl.BlockSpec((tm, D), lambda i: (i, 0)),
                    _const_spec((V, D), lambda i: (0, 0)),
                    _const_spec((1, V), lambda i: (0, 0)),
                ],
                out_specs=(pl.BlockSpec((tm, V), lambda i: (i, 0)),
                           pl.BlockSpec((tm, 1), lambda i: (i, 0))),
            ),
            compiler_params=pltpu.CompilerParams(
                dimension_semantics=("parallel",), **cparams),
        )(h_p, w_b, b2d)
        return logits[:M], argm[:M, 0]

    # ------- vocab-tiled path with online running argmax ---------------------
    V_pad = _round_up(V, tv)
    b_p = b.astype(jnp.float32)
    if V_pad != V:
        w_b = jnp.pad(w_b, ((0, V_pad - V), (0, 0)))
        b_p = jnp.pad(b_p, (0, V_pad - V),
                      constant_values=float(np.finfo(np.float32).min))
    b2d = b_p.reshape(1, V_pad)

    logits, argm = pl.pallas_call(
        _classifier_tiled_kernel,
        out_shape=(jax.ShapeDtypeStruct((M_pad, V_pad), out_dtype),
                   jax.ShapeDtypeStruct((M_pad, 1), jnp.int32)),
        grid_spec=pltpu.PrefetchScalarGridSpec(
            num_scalar_prefetch=0,
            grid=(M_pad // tm, V_pad // tv),                # vocab axis innermost
            in_specs=[
                pl.BlockSpec((tm, D), lambda i, j: (i, 0)),
                pl.BlockSpec((tv, D), lambda i, j: (j, 0)),
                pl.BlockSpec((1, tv), lambda i, j: (0, j)),
            ],
            out_specs=(pl.BlockSpec((tm, tv), lambda i, j: (i, j)),
                       pl.BlockSpec((tm, 1), lambda i, j: (i, 0))),
            scratch_shapes=[pltpu.VMEM((tm, 1), jnp.float32),
                            pltpu.VMEM((tm, 1), jnp.int32)],
        ),
        compiler_params=pltpu.CompilerParams(
            dimension_semantics=("parallel", "arbitrary"), **cparams),
    )(h_p, w_b, b2d)
    return logits[:M, :V], argm[:M, 0]


# ------------------------------ UniTAB glue -----------------------------------

def outputsclass_2_predbboxes(pred_seq, num_bins):
    # do_flickrgrounding=False, do_refexp=False branch of the reference code.
    pb = pred_seq[:, :4].astype(jnp.float32)
    pb = (pb - 2.0) / (num_bins - 1)
    cxcy = (pb[:, :2] + pb[:, 2:]) / 2.0
    wh = pb[:, 2:] - pb[:, :2]
    boxes = jnp.concatenate([cxcy, wh], axis=-1)
    return jnp.maximum(boxes, 0.0)[:, None, :]             # .clip(min=0).unsqueeze(1)


def unitab_decode(hs_last, embed_w, cls_b, num_bins, *, tv=None):
    """coordclass_embed(hs[-1]) -> logits, pred_seq = argmax, pred_boxes."""
    B, S, D = hs_last.shape
    V = embed_w.shape[0]
    h2d = hs_last.reshape(B * S, D)
    # embed_w is consumed as (V, D) directly (contraction over D in-kernel):
    # no per-forward (D, V) transpose pass is ever materialized.
    logits, argm = classifier_with_argmax(h2d, embed_w, cls_b, tv=tv)
    outputs_class = logits.reshape(B, S, V)
    pred_seq = argm.reshape(B, S)
    pred_boxes = outputsclass_2_predbboxes(pred_seq, num_bins)
    return {"pred_logits": outputs_class,
            "pred_seq": pred_seq,
            "pred_boxes": pred_boxes}


# --------------------------------- main ----------------------------------------

if __name__ == "__main__":
    key = jax.random.PRNGKey(0)
    k_src, k_hs, k_pw, k_pb, k_emb = jax.random.split(key, 5)

    # small, shape-consistent configuration (H*W = 256 -> lane-dense stores)
    B, Cin, H, W = 2, 8, 16, 16        # backbone.num_channels = 8
    D = 32                             # transformer.d_model
    S = 8                              # decoded sequence length
    num_queries = 126                  # num_bins
    text_vocab = 128
    V = text_vocab + num_queries + 2   # 256, tied vocab size

    # deterministic parameters (module __init__ shapes)
    proj_w = jax.random.normal(k_pw, (D, Cin, 1, 1), jnp.float32) * 0.05
    proj_b = jax.random.normal(k_pb, (D,), jnp.float32) * 0.05
    embed_w = jax.random.normal(k_emb, (V, D), jnp.float32) * 0.05  # tied embeddings
    cls_b = jnp.zeros((V,), jnp.float32)                            # Classifier bias

    # parameter casts done once at "load time" (not per forward)
    proj_w_bf16 = proj_w.astype(jnp.bfloat16)
    embed_w_bf16 = embed_w.astype(jnp.bfloat16)

    # synthetic backbone feature map / decoder hidden states
    src = jax.random.normal(k_src, (B, Cin, H, W), jnp.float32)
    hs_last = jax.random.normal(k_hs, (B, S, D), jnp.float32)

    # encode_and_save=True hot path: input_proj (1x1 conv) on the MXU.
    # thw=128 exercises the spatial tiling (grid=(2,2)); auto-pick would use
    # a single 256-wide tile at these toy shapes.
    proj = unitab_input_proj(src, proj_w_bf16, proj_b, thw=128)

    # encode_and_save=False hot path: coordclass_embed + argmax + box decode
    # (fused single-vocab-step path: V=256 fits the VMEM budget).
    out = unitab_decode(hs_last, embed_w_bf16, cls_b, num_queries)

    # also exercise the vocab-tiled online-argmax fallback (forced tv=128)
    logits_t, argm_t = classifier_with_argmax(
        hs_last.reshape(B * S, D), embed_w_bf16, cls_b, tv=128)

    jax.block_until_ready((proj, out["pred_logits"], out["pred_seq"],
                           out["pred_boxes"], logits_t, argm_t))

    # --- correctness checks vs pure-JAX references (bf16 MXU -> loose tol) ---
    ref_proj = (jnp.einsum("nchw,dc->ndhw", src, proj_w.reshape(D, Cin),
                           precision=jax.lax.Precision.HIGHEST)
                + proj_b[None, :, None, None])
    np.testing.assert_allclose(np.asarray(proj), np.asarray(ref_proj),
                               rtol=2e-2, atol=2e-2)

    ref_logits = (jnp.einsum("bsd,vd->bsv", hs_last, embed_w,
                             precision=jax.lax.Precision.HIGHEST) + cls_b)
    np.testing.assert_allclose(np.asarray(out["pred_logits"]),
                               np.asarray(ref_logits), rtol=2e-2, atol=2e-2)
    np.testing.assert_allclose(np.asarray(logits_t.reshape(B, S, V)),
                               np.asarray(ref_logits), rtol=2e-2, atol=2e-2)

    # fused argmax must exactly match argmax of the kernel's own logits
    assert np.array_equal(np.asarray(out["pred_seq"]),
                          np.asarray(jnp.argmax(out["pred_logits"], axis=-1)))
    # tiled-path running argmax must exactly match argmax of its own logits
    assert np.array_equal(np.asarray(argm_t),
                          np.asarray(jnp.argmax(logits_t, axis=-1)))

    # box-decode reference (default branch of outputsclass_2_predbboxes)
    ps = np.asarray(out["pred_seq"])[:, :4].astype(np.float32)
    ps = (ps - 2.0) / (num_queries - 1)
    ref_boxes = np.concatenate(
        [(ps[:, :2] + ps[:, 2:]) / 2.0, ps[:, 2:] - ps[:, :2]], axis=-1)
    ref_boxes = np.clip(ref_boxes, 0.0, None)[:, None, :]
    np.testing.assert_allclose(np.asarray(out["pred_boxes"]), ref_boxes,
                               rtol=1e-6, atol=1e-6)

    print("KERNEL_OK")
</pallas_src>

<mosaic_0001>
module attributes {stable_mosaic.version = 11 : i64} {
  func.func @_proj_kernel(%arg0: i32, %arg1: i32, %arg2: memref<1x8x128xf32, #tpu.memory_space<vmem>>, %arg3: memref<32x8xbf16, #tpu.memory_space<vmem>>, %arg4: memref<32x1xf32, #tpu.memory_space<vmem>>, %arg5: memref<1x32x128xf32, #tpu.memory_space<vmem>>) attributes {dimension_semantics = [#tpu.dimension_semantics<parallel>, #tpu.dimension_semantics<parallel>], iteration_bounds = array<i64: 2, 2>, scalar_prefetch = 0 : i64, scratch_operands = 0 : i64, tpu.core_type = #tpu.core_type<tc>, window_params = [{transform_indices = @transform_0, window_bounds = array<i64: 1, 8, 128>}, {pipeline_mode = #tpu.pipeline_mode<synchronous>, transform_indices = @transform_1, window_bounds = array<i64: 32, 8>}, {pipeline_mode = #tpu.pipeline_mode<synchronous>, transform_indices = @transform_2, window_bounds = array<i64: 32, 1>}, {transform_indices = @transform_3, window_bounds = array<i64: 1, 32, 128>}]} {
    %c0 = arith.constant 0 : index
    %c0_0 = arith.constant 0 : index
    %c0_1 = arith.constant 0 : index
    %0 = vector.load %arg2[%c0, %c0_0, %c0_1] : memref<1x8x128xf32, #tpu.memory_space<vmem>>, vector<1x8x128xf32>
    %1 = vector.shape_cast %0 : vector<1x8x128xf32> to vector<8x128xf32>
    %2 = arith.truncf %1 : vector<8x128xf32> to vector<8x128xbf16>
    %c0_2 = arith.constant 0 : index
    %c0_3 = arith.constant 0 : index
    %3 = vector.load %arg3[%c0_2, %c0_3] : memref<32x8xbf16, #tpu.memory_space<vmem>>, vector<32x8xbf16>
    %cst = arith.constant dense<0.000000e+00> : vector<32x128xf32>
    %4 = tpu.matmul %3, %2, %cst {dimension_numbers = #tpu.dot_dimension_numbers<[1], [0], [0], [1], [0, 0, 1, 1], [], []>} : vector<32x8xbf16>, vector<8x128xbf16>, vector<32x128xf32> -> vector<32x128xf32>
    %c0_4 = arith.constant 0 : index
    %c0_5 = arith.constant 0 : index
    %5 = vector.load %arg4[%c0_4, %c0_5] : memref<32x1xf32, #tpu.memory_space<vmem>>, vector<32x1xf32>
    %6 = vector.broadcast %5 : vector<32x1xf32> to vector<32x128xf32>
    %7 = arith.addf %4, %6 : vector<32x128xf32>
    %c0_6 = arith.constant 0 : index
    %c0_7 = arith.constant 0 : index
    %c0_8 = arith.constant 0 : index
    %8 = vector.load %arg5[%c0_6, %c0_7, %c0_8] : memref<1x32x128xf32, #tpu.memory_space<vmem>>, vector<1x32x128xf32>
    %9 = vector.shape_cast %8 : vector<1x32x128xf32> to vector<32x128xf32>
    %10 = vector.shape_cast %7 : vector<32x128xf32> to vector<1x32x128xf32>
    tpu.vector_store %arg5[%c0_6, %c0_7, %c0_8], %10 {strides = array<i32>} : memref<1x32x128xf32, #tpu.memory_space<vmem>>, vector<1x32x128xf32>,
    return
  }
  func.func @transform_0(%arg0: i32, %arg1: i32) -> (i32, i32, i32) {
    %c0_i32 = arith.constant 0 : i32
    %c0_i32_0 = arith.constant 0 : i32
    return %arg0, %c0_i32, %arg1 : i32, i32, i32
  }
  func.func @transform_1(%arg0: i32, %arg1: i32) -> (i32, i32) {
    %c0_i32 = arith.constant 0 : i32
    %c0_i32_0 = arith.constant 0 : i32
    %c0_i32_1 = arith.constant 0 : i32
    return %c0_i32, %c0_i32_0 : i32, i32
  }
  func.func @transform_2(%arg0: i32, %arg1: i32) -> (i32, i32) {
    %c0_i32 = arith.constant 0 : i32
    %c0_i32_0 = arith.constant 0 : i32
    %c0_i32_1 = arith.constant 0 : i32
    return %c0_i32, %c0_i32_0 : i32, i32
  }
  func.func @transform_3(%arg0: i32, %arg1: i32) -> (i32, i32, i32) {
    %c0_i32 = arith.constant 0 : i32
    %c0_i32_0 = arith.constant 0 : i32
    return %arg0, %c0_i32, %arg1 : i32, i32, i32
  }
}

</mosaic_0001>

<bundles_post_ra>
// kernel: tpu_custom_call.1
= control target key start
LH: loop header
LB: loop body
LE: loop exit
PB: predicated region body
PF: predicated region fallthrough
CT: control target
= control target key end

     0   :  { %8 = vsyncpa [#allocation3], 0  ;;  %s779_s0 = inlined_call_operand.vmem [shape: f32[2,8,256], index: 0, kind: input, shape index: {}]   ;;  %s780_s1 = inlined_call_operand.vmem [shape: bf16[32,8], index: 1, kind: input, shape index: {}]   ;;  %s781_s2 = inlined_call_operand.vmem [shape: f32[32,1], index: 2, kind: input, shape index: {}]   ;;  %s782_s3 = inlined_call_operand.hbm [shape: f32[2,32,256], index: 3, kind: output, shape index: {}]  }
   0x1   :  { %10 = vsyncpa [#allocation3 + $0x1], 0  ;;  %s620_s12 = smov 0   ;;  %s622_s13 = smov 0  }
   0x2   :  { %s624_s14 = smov 0   ;;  %s626_s15 = smov 0  }
   0x3   :  { %s628_s16 = smov 0   ;;  %s630_s17 = smov 0  }
   0x4   :  { %s632_s18 = smov 0   ;;  %s634_s19 = smov 0  }
   0x5 LB: > { %s395_s20 = sadd.s32 4294967295, %s593_s19   ;;  %s396_s21 = sadd.s32 4294967294, %s593_s19   ;;  %s593_s19 = sphi %s634_s19, %s16_s19   ;;  %s589_s18 = sphi %s632_s18, %s791_s18   ;;  %s585_s17 = sphi %s630_s17, %s790_s17   ;;  %s581_s16 = sphi %s628_s16, %s789_s16   ;;  %s577_s15 = sphi %s626_s15, %s788_s15   ;;  %s573_s14 = sphi %s624_s14, %s787_s14   ;;  %s569_s13 = sphi %s622_s13, %s786_s13   ;;  %s565_s12 = sphi %s620_s12, %s785_s12  }
   0x6   : > { %s25_s22 = sadd.s32 1, %s585_s17  ;;  %s28_s23 = sadd.s32 1, %s589_s18 }
   0x7   : > { %p26_p0 = scmp.ge.s32.totalorder %s25_s22, 2  ;;  %p117_p1 = scmp.ne.s32.totalorder %s573_s14, %s569_s13 }
   0x8   : > { %p118_p2 = scmp.eq.s32.totalorder %s395_s20, 3  ;;  %p123_p5 = scmp.ne.s32.totalorder %s569_s13, %s565_s12 }
   0x9   : > { %s793_s22 = smov (%p26_p0, %s25_s22), 0  ;;  %s795_s23 = smov (!%p26_p0, %s28_s23), %s589_s18 }
   0xa   : > { %s103_s24 = ssub.s32 %s585_s17, %s793_s22  ;;  %p671_p3 = por %p118_p2, %p117_p1 }
   0xb   : > { %p30_p4 = scmp.ge.s32.totalorder %s795_s23, 2  ;;  %p124_p6 = scmp.eq.s32.totalorder %s396_s21, 3 }
   0xc   : > { %p399_p7 = scmp.ge.s32.totalorder %s593_s19, 1  ;;  %p159_p9 = scmp.lt.s32.totalorder %s593_s19, 5 }
   0xd   : > { %s797_s23 = smov (%p30_p4, %s795_s23), 0  ;;  %p680_p8 = por %p124_p6, %p123_p5 }
   0xe   : > { %s102_s27 = ssub.s32 %s589_s18, %s797_s23  ;;  %s107_s28 = sadd.s32 1, %s573_s14 }
   0xf   : > { %s104_s29 = sor.u32 %s103_s24, %s102_s27  ;;  %p160_p10 = pnand %p399_p7, %p159_p9 }
  0x10   : > { %p105_p11 = scmp.eq.s32.totalorder %s104_s29, 0  ;;  %p186_p12 = scmp.lt.s32.totalorder (!%p160_p10), %s581_s16, 1 }
  0x11   : > { %163 = sbr.rel (%p160_p10) target bundleno = 251 (0xfb), region = 32  ;;  %p188_p13 = scmp.lt.s32.totalorder (!%p160_p10), %s577_s15, 1 }
  0x12   : > { %s689_s30 = scalar_select %p105_p11, %s573_s14, %s107_s28  }
  0x13   : > { %s183_s10 = sand.u32 (!%p160_p10), 1, %s569_s13   ;;  %s596_s7 = smov (!%p160_p10), [#allocation2]  }
  0x16   : > { %v499_v0 = vld [vmem:[%s780_s1] sm:$0xff]   ;;  %vm235_vm0 = vcmask 64512   ;;  %s187_s6 = scalar_select %p186_p12, %s581_s16, 1  ;;  %v203_v1 = vld [vmem:[%s781_s2 + $0x10] sm:$0xff]  ;;  %v595_v3 = vmov 0   ;;  %v204_v4 = vld [vmem:[%s781_s2 + $0x18] sm:$0xff] }
  0x17   : > { %417 = vmatprep.mubr.msk.bf16.mxu0 %vm235_vm0, %v499_v0  ;;  %v201_v2 = vld [vmem:[%s781_s2] sm:$0xff]  ;;  %s189_s11 = scalar_select %p188_p13, %s577_s15, 1  ;;  %498 = vset.pattern.permute.xlu1 %v595_v3  ;;  %v202_v5 = vld [vmem:[%s781_s2 + $0x8] sm:$0xff]  ;;  %vm242_vm1 = vcmask 1043456  }
  0x18   : > { %497 = vset.pattern.permute.xlu0 %v595_v3  ;;  %s401_s20 = sshll.u32 %s187_s6, 1  ;;  %217 = vperm.xlu1 %498, %v203_v1   ;;  %v500_v9 = vld [vmem:[%s780_s1 + $0x8] sm:$0xff]  }
  0x19   : > { %207 = vperm.xlu0 %497, %v201_v2   ;;  %s191_s21 = sadd.s32 %s401_s20, %s189_s11  ;;  %s400_s11 = sshll.u32 %s183_s10, 5 }
  0x1a   : > { %s402_s4 = sshll.u32 %s191_s21, 3  ;;  %s408_s20 = sshll.u32 %s581_s16, 3 }
  0x1b   : > { %s193_s8 = scalar_lea.vmem %s779_s0, %s402_s4  ;;  %s311_s21 = sadd.s32 %s577_s15, %s408_s20 }
  0x1c   : > { %v195_v6 = vld [vmem:[%s193_s8] sm:$0xff]  ;;  %222 = vperm.xlu1 %498, %v204_v4   ;;  %s185_s24 = scalar_lea.vmem [#allocation2], %s400_s11  ;;  %s409_s28 = sshll.u32 %s311_s21, 7 }
  0x1d   : > { %212 = vperm.xlu0 %497, %v202_v5   ;;  %v196_v7 = vpack.c.bf16 %v195_v6, %v195_v6  ;;  %s314_s27 = sshll.u32 %s185_s24, 4  ;;  %s726_s29 = scalar_lea.hbm %s782_s3, %s409_s28  ;;  %s721_s27 = int_to_ptr.vmem [resolvable:$true] %s314_s27 }
  0x1e   : > { %s728_s4 = scalar_lea.sflag [#allocation3], %s183_s10  ;;  %s501_s5 = scalar_lea.vmem %s721_s27, 512 }
  0x1f   : > { %421 = vmatprep.subr.msk.bf16.mxu0 %vm242_vm1, %v196_v7  ;;  %v244_v8 = vsel %vm242_vm1, %v196_v7, 0  ;;  %p502_p0 = scmp.ne.s32.totalorder %s721_s27, %s501_s5  ;;  %s505_s8 = sshll.u32 %s596_s7, 4  ;;  %s506_s8 = int_to_ptr.vmem [resolvable:$false] %s505_s8 }
  0x20   : > { %416 = vmatpush3.bf16.msra.mxu0 %v244_v8  ;;  %s507_s6 = scalar_lea.vmem %s506_s8, 1024  ;;  %p508_p4 = scmp.lt.s32.totalorder %s721_s27, %s506_s8 }
  0x21   : > { %p503_p1 = pnand %p502_p0, %p671_p3  ;;  %p509_p5 = scmp.lt.s32.totalorder %s507_s6, %s501_s5 }
  0x23   : > { %418 = vmatmul.mubr.msk.bf16.vlgmr.msra.gmra.mxu0 %vm235_vm0, %v500_v9  ;;  %p504_p2 = pneg %p503_p1  ;;  %p510_p6 = por %p509_p5, %p508_p4 }
  0x25   : > { %p511_p7 = pnand %p510_p6, %p504_p2 }
  0x93   : > { %v218_v10 = vpop.permute.xlu1 %217 }
  0x94   : > { %v208_v11 = vpop.permute.xlu0 %207 }
  0x97   : > { %v223_v16 = vpop.permute.xlu1 %222 }
  0x98   : > { %v213_v19 = vpop.permute.xlu0 %212 }
  0xe3   : > { %v419_v12 = vpop.f32.mrf.mxu0 }
  0xe4   : > { %v289_v13 = vadd.f32 %v419_v12, %v218_v10 }
  0xe5   : > { %v280_v14 = vpop.f32.mrf.mxu0 }
  0xe6   : > { %297 = vst [vmem:[%s185_s24 + $0x10] sm:$0xff] %v289_v13  ;;  %v281_v15 = vadd.f32 %v280_v14, %v208_v11 }
  0xe7   : > { %v420_v17 = vpop.f32.mrf.mxu0 }
  0xe8   : > { %295 = vst [vmem:[%s185_s24] sm:$0xff] %v281_v15  ;;  %v292_v18 = vadd.f32 %v420_v17, %v223_v16 }
  0xe9   : > { %v283_v20 = vpop.f32.mrf.mxu0 }
  0xea   : > { %298 = vst [vmem:[%s185_s24 + $0x18] sm:$0xff] %v292_v18  ;;  %v284_v21 = vadd.f32 %v283_v20, %v213_v19 }
  0xec   : > { %296 = vst [vmem:[%s185_s24 + $0x8] sm:$0xff] %v284_v21 }
  0xed   : > { %514 = shalt.err (!%p511_p7)
}
  0xee   : > { %s515_s9 = scalar_lea.hbm %s726_s29, 512  ;;  %s519_s20 = scalar_lea.hbm %s782_s3, 2048 }
  0xef   : > { %p516_p9 = scmp.ne.s32.totalorder %s726_s29, %s515_s9  ;;  %p520_p12 = scmp.lt.s32.totalorder %s726_s29, %s782_s3 }
  0xf0   : > { %p521_p13 = scmp.lt.s32.totalorder %s519_s20, %s515_s9 }
  0xf1   : > { %p517_p10 = pnand %p516_p9, %p671_p3 }
  0xf2   : > { %p522_p0 = por %p521_p13, %p520_p12 }
  0xf3   : > { %p518_p11 = pneg %p517_p10 }
  0xf5   : > { %p523_p1 = pnand %p522_p0, %p518_p11 }
  0xf7   : > { %526 = shalt.err (!%p523_p1)
}
  0xf8   : > { %s597_s28 = smov 128   ;;  %s598_s15 = smov 256  }
  0xf9   : > { %s599_s16 = smov 8  }
  0xfa   : > { %422 = dma.vmem_to_hbm [thread:$0]  (%p671_p3), %s721_s27, 512, %s726_s29, %s728_s4, %s597_s28, %s598_s15, %s599_s16  }
  0xfb PF: > { %p428_p2 = scmp.ge.s32.totalorder %s593_s19, 2  ;;  %s329_s5 = sand.u32 1, %s565_s12  }
  0xfc   : > { %s330_s7 = scalar_lea.sflag [#allocation3], %s329_s5 }
  0xfd   : > { %p425_p4 = pnand %p428_p2, %p680_p8 }
  0xff   : > { %p426_p5 = pneg %p425_p4 }
 0x101   : > { %560 = dma.done.wait (%p426_p5), %s330_s7, 512  }
 0x102   : > { %562 = vsyncadd (%p426_p5), %s330_s7, 4294966784  ;;  %s16_s19 = sadd.s32 1, %s593_s19   ;;  %s785_s12 = smov %s569_s13 }
 0x103   : > { %p13_p6 = scmp.ge.s32.totalorder %s16_s19, 6   ;;  %s786_s13 = smov %s573_s14 }
 0x104   : > { %s787_s14 = smov %s689_s30  ;;  %s788_s15 = smov %s585_s17 }
 0x105   : > { %s789_s16 = smov %s589_s18  ;;  %s790_s17 = smov %s793_s22 }
 0x106   : > { %s791_s18 = smov %s797_s23  ;;  %15 = sbr.rel (!%p13_p6) target bundleno = 5 (0x5), region = 67 }
 0x10b   :  { %335 = vsyncpa [#allocation3], 1 }
 0x10c   :  { %337 = vsyncpa [#allocation3 + $0x1], 1 }

</bundles_post_ra>
